<compile_context>
chip_gen: v6e
topology: v6e:2x2x1
jax: 0.10.0
libtpu: 0.0.40
codegen_flags: <defaults>
</compile_context>

<pallas_src>
from functools import partial

import jax
import jax.numpy as jnp
from jax import lax
from jax.experimental import pallas as pl
from jax.experimental.pallas import tpu as pltpu


def _round_up(n, m):
    return ((n + m - 1) // m) * m


def _cdiv(a, b):
    return -(-a // b)


def _cosine_sim_kernel(x_ref, y_ref, ix_ref, iy_ref, o_ref):
    k = pl.program_id(2)

    @pl.when(k == 0)
    def _init():
        o_ref[...] = jnp.zeros_like(o_ref)

    # Pairwise dot products: contract the H axis of *both* operands so the MXU
    # consumes y as stored (no transpose / extra VMEM copy).  Accumulate
    # directly into the resident f32 output block.
    o_ref[...] += lax.dot_general(
        x_ref[...], y_ref[...],
        dimension_numbers=(((1,), (1,)), ((), ())),
        preferred_element_type=jnp.float32,
    )

    @pl.when(k == pl.num_programs(2) - 1)
    def _finalize():
        # inv_x already carries 1/temp; two broadcast multiplies, no divides.
        o_ref[...] = o_ref[...] * ix_ref[...] * iy_ref[...]


def _tile_and_pad(extent, cap, multiple):
    """Pick a tile (multiple of `multiple`, ~<= cap) then pad extent to it."""
    cap = max(cap, multiple)
    ntiles = max(1, _cdiv(extent, cap))
    tile = _round_up(_cdiv(extent, ntiles), multiple)
    ntiles = _cdiv(extent, tile)
    return tile, tile * ntiles


def _pick_tiles(M, N, H, itemsize):
    """Generation-aware tile sizes; returns (tm, m_pad, tn, n_pad, tk, h_pad)."""
    try:
        vmem_cap = pltpu.get_tpu_info().vmem_capacity_bytes
    except Exception:  # conservative fallback (v7x-sized VMEM)
        vmem_cap = 64 * 1024 * 1024
    big_vmem = vmem_cap >= 100 * 1024 * 1024          # v5e / v6e: 128 MiB

    sub = 8 if itemsize >= 4 else (16 if itemsize == 2 else 32)

    if big_vmem:
        mn_cap = 1024 if itemsize <= 2 else 512       # v6e: big bf16 tiles
    else:
        mn_cap = 512                                  # v7x

    tm, m_pad = _tile_and_pad(M, mn_cap, sub)         # M is sublane-only
    tn, n_pad = _tile_and_pad(N, mn_cap, 128)         # N is the output lane dim

    tk_cap = 512 if max(tm, tn) >= 512 else 1024
    tk, h_pad = _tile_and_pad(H, tk_cap, 128)

    # Degenerate (1,1,K) grid: split one parallel axis so both v7x TCs get work
    # (negligible cost elsewhere: one extra 0.35 us grid step).
    if (m_pad // tm) * (n_pad // tn) == 1:
        if tn >= 256 and tn % 256 == 0:
            tn //= 2
        elif tm >= 2 * sub:
            tm = _round_up(_cdiv(M, 2), sub)
            m_pad = 2 * tm

    return tm, m_pad, tn, n_pad, tk, h_pad


def similarity(x, y, *, temp, eps=1e-8, use_bf16_matmul=False):
    """Pallas equivalent of Similarity.forward for the broadcast (B,1,H)x(1,B,H) call.

    x: (M, 1, H) or (M, H);  y: (1, N, H) or (N, H)
    returns (M, N) float32: cos(x_i, y_j) / temp
    """
    if x.ndim == 3:
        x = jnp.squeeze(x, axis=1)
    if y.ndim == 3:
        y = jnp.squeeze(y, axis=0)
    M, H = x.shape
    N, H2 = y.shape
    assert H == H2, (x.shape, y.shape)

    # ---- one-time norm precompute (hoisted out of the k-loop) ----
    x2 = jnp.sum(jnp.square(x.astype(jnp.float32)), axis=-1, keepdims=True)  # (M,1)
    y2 = jnp.sum(jnp.square(y.astype(jnp.float32)), axis=-1, keepdims=True)  # (N,1)
    eps_sq = float(eps) * float(eps)
    inv_x = lax.rsqrt(jnp.maximum(x2, eps_sq)) * jnp.float32(1.0 / temp)     # (M,1)
    inv_y = jnp.transpose(lax.rsqrt(jnp.maximum(y2, eps_sq)))                # (1,N)

    # Optional: feed the MXU bf16 operands (halves HBM traffic of the k-loop).
    xm = x.astype(jnp.bfloat16) if (use_bf16_matmul and x.dtype == jnp.float32) else x
    ym = y.astype(jnp.bfloat16) if (use_bf16_matmul and y.dtype == jnp.float32) else y
    itemsize = jnp.dtype(xm.dtype).itemsize

    tm, m_pad, tn, n_pad, tk, h_pad = _pick_tiles(M, N, H, itemsize)

    # Zero padding is exact: padded rows have inv == 0 and contribute 0 dots,
    # and the padded region is sliced off after the call.
    xp = jnp.pad(xm, ((0, m_pad - M), (0, h_pad - H))) if (m_pad, h_pad) != (M, H) else xm
    yp = jnp.pad(ym, ((0, n_pad - N), (0, h_pad - H))) if (n_pad, h_pad) != (N, H) else ym
    inv_x_p = jnp.pad(inv_x, ((0, m_pad - M), (0, 0)))
    inv_y_p = jnp.pad(inv_y, ((0, 0), (0, n_pad - N)))

    grid = (m_pad // tm, n_pad // tn, h_pad // tk)

    # Advisory cost estimate for XLA scheduling around the custom call.
    cost = pl.CostEstimate(
        flops=int(2 * m_pad * n_pad * h_pad),
        transcendentals=0,
        bytes_accessed=int(m_pad * h_pad * itemsize * grid[1]
                           + n_pad * h_pad * itemsize * grid[0]
                           + m_pad * n_pad * 4),
    )

    # VMEM budget: double-buffered input tiles + output tile + inv vectors.
    vmem_need = (2 * (tm + tn) * tk * itemsize          # x/y tiles, double-buffered
                 + 2 * tm * tn * 4                      # resident f32 output tile
                 + 2 * (tm + 8 * tn) * 128 * 4 // 128 * 128 // 128)  # inv vecs (tiny)
    vmem_limit = int(min(48 * 1024 * 1024, max(32 * 1024 * 1024, 2 * vmem_need)))

    out = pl.pallas_call(
        _cosine_sim_kernel,
        out_shape=jax.ShapeDtypeStruct((m_pad, n_pad), jnp.float32),
        grid_spec=pltpu.PrefetchScalarGridSpec(
            num_scalar_prefetch=0,
            grid=grid,
            in_specs=[
                pl.BlockSpec((tm, tk), lambda i, j, k: (i, k)),   # x tile
                pl.BlockSpec((tn, tk), lambda i, j, k: (j, k)),   # y tile
                pl.BlockSpec((tm, 1), lambda i, j, k: (i, 0)),    # inv_x column
                pl.BlockSpec((1, tn), lambda i, j, k: (0, j)),    # inv_y row
            ],
            out_specs=pl.BlockSpec((tm, tn), lambda i, j, k: (i, j)),
        ),
        compiler_params=pltpu.CompilerParams(
            dimension_semantics=("parallel", "parallel", "arbitrary"),
            vmem_limit_bytes=vmem_limit,
        ),
        cost_estimate=cost,
    )(xp, yp, inv_x_p, inv_y_p)

    return out[:M, :N]


def _reference(x, y, temp, eps=1e-8):
    # Pure-JAX reference of F.cosine_similarity(x, y, dim=-1) / temp
    if x.ndim == 3:
        x = jnp.squeeze(x, axis=1)
    if y.ndim == 3:
        y = jnp.squeeze(y, axis=0)
    dots = x @ y.T
    xn = jnp.maximum(jnp.linalg.norm(x, axis=-1, keepdims=True), eps)
    yn = jnp.maximum(jnp.linalg.norm(y, axis=-1, keepdims=True), eps)
    return dots / (xn * yn.T) / temp


if __name__ == "__main__":
    B, H = 8, 32
    temp = 0.05  # typical SimCSE / condenser temperature

    key = jax.random.PRNGKey(0)
    kx, ky = jax.random.split(key)
    # PyTorch-style broadcast inputs: (B, 1, H) and (1, B, H)
    x = jax.random.normal(kx, (B, 1, H), dtype=jnp.float32)
    y = jax.random.normal(ky, (1, B, H), dtype=jnp.float32)

    out = similarity(x, y, temp=temp)
    out = jax.block_until_ready(out)

    ref = _reference(x, y, temp)
    assert out.shape == (B, B), out.shape
    assert jnp.max(jnp.abs(out - ref)) < 5e-4, float(jnp.max(jnp.abs(out - ref)))

    print("KERNEL_OK")
</pallas_src>

<mosaic_0001>
module attributes {stable_mosaic.version = 11 : i64} {
  func.func @_cosine_sim_kernel(%arg0: i32, %arg1: i32, %arg2: i32, %arg3: memref<8x128xf32, #tpu.memory_space<vmem>>, %arg4: memref<128x128xf32, #tpu.memory_space<vmem>>, %arg5: memref<8x1xf32, #tpu.memory_space<vmem>>, %arg6: memref<1x128xf32, #tpu.memory_space<vmem>>, %arg7: memref<8x128xf32, #tpu.memory_space<vmem>>) attributes {dimension_semantics = [#tpu.dimension_semantics<parallel>, #tpu.dimension_semantics<parallel>, #tpu.dimension_semantics<arbitrary>], iteration_bounds = array<i64: 1, 1, 1>, scalar_prefetch = 0 : i64, scratch_operands = 0 : i64, tpu.core_type = #tpu.core_type<tc>, window_params = [{transform_indices = @transform_0, window_bounds = array<i64: 8, 128>}, {transform_indices = @transform_1, window_bounds = array<i64: 128, 128>}, {transform_indices = @transform_2, window_bounds = array<i64: 8, 1>}, {transform_indices = @transform_3, window_bounds = array<i64: 1, 128>}, {transform_indices = @transform_4, window_bounds = array<i64: 8, 128>}]} {
    %c0_i32 = arith.constant 0 : i32
    %0 = arith.cmpi eq, %arg2, %c0_i32 : i32
    %1 = arith.extui %0 : i1 to i32
    %c0_i32_0 = arith.constant 0 : i32
    %2 = arith.cmpi ne, %1, %c0_i32_0 : i32
    scf.if %2 {
      %cst_10 = arith.constant 0.000000e+00 : f32
      %12 = vector.broadcast %cst_10 : f32 to vector<8x128xf32>
      %c0_11 = arith.constant 0 : index
      %c0_12 = arith.constant 0 : index
      %13 = vector.load %arg7[%c0_11, %c0_12] : memref<8x128xf32, #tpu.memory_space<vmem>>, vector<8x128xf32>
      tpu.vector_store %arg7[%c0_11, %c0_12], %12 {strides = array<i32>} : memref<8x128xf32, #tpu.memory_space<vmem>>, vector<8x128xf32>,
    } else {
    }
    %c0 = arith.constant 0 : index
    %c0_1 = arith.constant 0 : index
    %3 = vector.load %arg7[%c0, %c0_1] : memref<8x128xf32, #tpu.memory_space<vmem>>, vector<8x128xf32>
    %c0_2 = arith.constant 0 : index
    %c0_3 = arith.constant 0 : index
    %4 = vector.load %arg3[%c0_2, %c0_3] : memref<8x128xf32, #tpu.memory_space<vmem>>, vector<8x128xf32>
    %c0_4 = arith.constant 0 : index
    %c0_5 = arith.constant 0 : index
    %5 = vector.load %arg4[%c0_4, %c0_5] : memref<128x128xf32, #tpu.memory_space<vmem>>, vector<128x128xf32>
    %cst = arith.constant dense<0.000000e+00> : vector<8x128xf32>
    %6 = tpu.matmul %4, %5, %cst {dimension_numbers = #tpu.dot_dimension_numbers<[1], [1], [0], [0], [0, 0, 1, 0], [], []>} : vector<8x128xf32>, vector<128x128xf32>, vector<8x128xf32> -> vector<8x128xf32>
    %7 = arith.addf %3, %6 : vector<8x128xf32>
    %c0_6 = arith.constant 0 : index
    %c0_7 = arith.constant 0 : index
    %8 = vector.load %arg7[%c0_6, %c0_7] : memref<8x128xf32, #tpu.memory_space<vmem>>, vector<8x128xf32>
    tpu.vector_store %arg7[%c0_6, %c0_7], %7 {strides = array<i32>} : memref<8x128xf32, #tpu.memory_space<vmem>>, vector<8x128xf32>,
    %c0_i32_8 = arith.constant 0 : i32
    %9 = arith.cmpi eq, %arg2, %c0_i32_8 : i32
    %10 = arith.extui %9 : i1 to i32
    %c0_i32_9 = arith.constant 0 : i32
    %11 = arith.cmpi ne, %10, %c0_i32_9 : i32
    scf.if %11 {
      %c0_10 = arith.constant 0 : index
      %c0_11 = arith.constant 0 : index
      %12 = vector.load %arg7[%c0_10, %c0_11] : memref<8x128xf32, #tpu.memory_space<vmem>>, vector<8x128xf32>
      %c0_12 = arith.constant 0 : index
      %c0_13 = arith.constant 0 : index
      %13 = vector.load %arg5[%c0_12, %c0_13] : memref<8x1xf32, #tpu.memory_space<vmem>>, vector<8x1xf32>
      %14 = vector.broadcast %13 : vector<8x1xf32> to vector<8x128xf32>
      %15 = arith.mulf %12, %14 : vector<8x128xf32>
      %c0_14 = arith.constant 0 : index
      %c0_15 = arith.constant 0 : index
      %16 = vector.load %arg6[%c0_14, %c0_15] : memref<1x128xf32, #tpu.memory_space<vmem>>, vector<1x128xf32>
      %17 = vector.broadcast %16 : vector<1x128xf32> to vector<8x128xf32>
      %18 = arith.mulf %15, %17 : vector<8x128xf32>
      %c0_16 = arith.constant 0 : index
      %c0_17 = arith.constant 0 : index
      %19 = vector.load %arg7[%c0_16, %c0_17] : memref<8x128xf32, #tpu.memory_space<vmem>>, vector<8x128xf32>
      tpu.vector_store %arg7[%c0_16, %c0_17], %18 {strides = array<i32>} : memref<8x128xf32, #tpu.memory_space<vmem>>, vector<8x128xf32>,
    } else {
    }
    return
  }
  func.func @transform_0(%arg0: i32, %arg1: i32, %arg2: i32) -> (i32, i32) {
    %c0_i32 = arith.constant 0 : i32
    return %arg0, %arg2 : i32, i32
  }
  func.func @transform_1(%arg0: i32, %arg1: i32, %arg2: i32) -> (i32, i32) {
    %c0_i32 = arith.constant 0 : i32
    return %arg1, %arg2 : i32, i32
  }
  func.func @transform_2(%arg0: i32, %arg1: i32, %arg2: i32) -> (i32, i32) {
    %c0_i32 = arith.constant 0 : i32
    %c0_i32_0 = arith.constant 0 : i32
    return %arg0, %c0_i32 : i32, i32
  }
  func.func @transform_3(%arg0: i32, %arg1: i32, %arg2: i32) -> (i32, i32) {
    %c0_i32 = arith.constant 0 : i32
    %c0_i32_0 = arith.constant 0 : i32
    return %c0_i32, %arg1 : i32, i32
  }
  func.func @transform_4(%arg0: i32, %arg1: i32, %arg2: i32) -> (i32, i32) {
    %c0_i32 = arith.constant 0 : i32
    return %arg0, %arg1 : i32, i32
  }
}

</mosaic_0001>

<bundles_post_ra>
// kernel: tpu_custom_call.1
= control target key start
LH: loop header
LB: loop body
LE: loop exit
PB: predicated region body
PF: predicated region fallthrough
CT: control target
= control target key end

     0   :  { %9 = vsyncpa [#allocation3], 0  ;;  %s314_s0 = inlined_call_operand.vmem [shape: f32[8,128], index: 0, kind: input, shape index: {}]   ;;  %s315_s1 = inlined_call_operand.hbm [shape: f32[128,128], index: 1, kind: input, shape index: {}]   ;;  %s316_s2 = inlined_call_operand.vmem [shape: f32[8,1], index: 2, kind: input, shape index: {}]   ;;  %s317_s3 = inlined_call_operand.vmem [shape: f32[1,128], index: 3, kind: input, shape index: {}]   ;;  %s318_s4 = inlined_call_operand.hbm [shape: f32[8,128], index: 4, kind: output, shape index: {}]  }
   0x1   :  { %10 = vsyncpa [#allocation4], 0  ;;  %s267_s15 = smov [#allocation2]  }
   0x2   :  { %s18_s16 = sshll.u32 %s267_s15, 4  ;;  %s19_s16 = int_to_ptr.vmem [resolvable:$true] %s18_s16 }
   0x3   :  { %s231_s17 = scalar_lea.vmem %s19_s16, 2048  ;;  %p236_p1 = scmp.lt.s32.totalorder %s19_s16, %s19_s16 }
   0x4   :  { %p232_p0 = scmp.ne.s32.totalorder %s19_s16, %s231_s17  ;;  %p237_p2 = scmp.lt.s32.totalorder %s231_s17, %s231_s17 }
   0x6   :  { %p238_p3 = por %p237_p2, %p236_p1 }
   0x8   :  { %p239_p4 = pnand %p238_p3, %p232_p0 }
   0xa   :  { %242 = shalt.err (!%p239_p4)
}
   0xb   :  { %s268_s18 = smov 128   ;;  %s269_s19 = smov 8  }
   0xc   :  { %24 = dma.hbm_to_vmem [thread:$0]  %s315_s1, 2048, %s19_s16, [#allocation3], %s268_s18, %s268_s18, %s269_s19  }
   0xd   :  { %263 = dma.done.wait [#allocation3], 2048  }
   0xe   :  { %264 = vsyncadd [#allocation3], 4294965248  ;;  %v270_v0 = vmov 0.0   ;;  %vm271_vm0 = vmmov 0   ;;  %v272_v1 = vmov 0   ;;  %v54_v2 = vld [vmem:[#allocation2 + $0x78] sm:$0xff] }
   0xf   :  { %180 = vmatprep.subr.mxu0 %v270_v0  ;;  %212 = vmatprep.mubr.msk.f32.mxu0 %vm271_vm0, %v270_v0  ;;  %v53_v3 = vld [vmem:[#allocation2 + $0x70] sm:$0xff]  ;;  %v131_v4 = vld [vmem:[%s316_s2] sm:$0xff]  ;;  %v52_v5 = vld [vmem:[#allocation2 + $0x68] sm:$0xff]  ;;  %s273_s26 = smov [#allocation5]  }
  0x10   :  { %222 = vset.pattern.permute.xlu0 %v272_v1  ;;  %181 = vmatpush3.xpose.msra.mxu0 %v54_v2  ;;  %v51_v6 = vld [vmem:[#allocation2 + $0x60] sm:$0xff]  ;;  %v50_v7 = vld [vmem:[#allocation2 + $0x58] sm:$0xff]  ;;  %v49_v8 = vld [vmem:[#allocation2 + $0x50] sm:$0xff]  ;;  %s153_s27 = sshll.u32 %s273_s26, 4  ;;  %s154_s27 = int_to_ptr.vmem [resolvable:$true] %s153_s27 }
  0x11   :  { %182 = vmatprep.subr.mxu0 %v270_v0  ;;  %134 = vperm.xlu0 %222, %v131_v4   ;;  %v48_v9 = vld [vmem:[#allocation2 + $0x48] sm:$0xff]  ;;  %v47_v10 = vld [vmem:[#allocation2 + $0x40] sm:$0xff]  ;;  %v46_v11 = vld [vmem:[#allocation2 + $0x38] sm:$0xff]  ;;  %s243_s28 = scalar_lea.vmem %s154_s27, 128  ;;  %p248_p6 = scmp.lt.s32.totalorder %s154_s27, %s154_s27 }
  0x12   :  { %v45_v12 = vld [vmem:[#allocation2 + $0x30] sm:$0xff]  ;;  %v44_v13 = vld [vmem:[#allocation2 + $0x28] sm:$0xff]  ;;  %v43_v14 = vld [vmem:[#allocation2 + $0x20] sm:$0xff]  ;;  %p244_p5 = scmp.ne.s32.totalorder %s154_s27, %s243_s28  ;;  %p249_p7 = scmp.lt.s32.totalorder %s243_s28, %s243_s28 }
  0x13   :  { %v42_v15 = vld [vmem:[#allocation2 + $0x18] sm:$0xff]  ;;  %v41_v16 = vld [vmem:[#allocation2 + $0x10] sm:$0xff]  ;;  %v40_v17 = vld [vmem:[#allocation2 + $0x8] sm:$0xff] }
  0x14   :  { %183 = vmatpush3.xpose.msra.mxu0 %v53_v3  ;;  %v39_v18 = vld [vmem:[#allocation2] sm:$0xff]  ;;  %p250_p8 = por %p249_p7, %p248_p6 }
  0x15   :  { %184 = vmatprep.subr.mxu0 %v270_v0  ;;  %v38_v19 = vld [vmem:[%s314_s0] sm:$0xff] }
  0x16   :  { %v162_v23 = vld [vmem:[%s317_s3] ss:$0 sm:$0xff]  ;;  %p251_p9 = pnand %p250_p8, %p244_p5 }
  0x18   :  { %185 = vmatpush3.xpose.msra.mxu0 %v52_v5 }
  0x19   :  { %186 = vmatprep.subr.mxu0 %v270_v0 }
  0x1c   :  { %187 = vmatpush3.xpose.msra.mxu0 %v51_v6 }
  0x1d   :  { %188 = vmatprep.subr.mxu0 %v270_v0 }
  0x20   :  { %189 = vmatpush3.xpose.msra.mxu0 %v50_v7 }
  0x21   :  { %190 = vmatprep.subr.mxu0 %v270_v0 }
  0x24   :  { %191 = vmatpush3.xpose.msra.mxu0 %v49_v8 }
  0x25   :  { %192 = vmatprep.subr.mxu0 %v270_v0 }
  0x28   :  { %193 = vmatpush3.xpose.msra.mxu0 %v48_v9 }
  0x29   :  { %194 = vmatprep.subr.mxu0 %v270_v0 }
  0x2c   :  { %195 = vmatpush3.xpose.msra.mxu0 %v47_v10 }
  0x2d   :  { %196 = vmatprep.subr.mxu0 %v270_v0 }
  0x30   :  { %197 = vmatpush3.xpose.msra.mxu0 %v46_v11 }
  0x31   :  { %198 = vmatprep.subr.mxu0 %v270_v0 }
  0x34   :  { %199 = vmatpush3.xpose.msra.mxu0 %v45_v12 }
  0x35   :  { %200 = vmatprep.subr.mxu0 %v270_v0 }
  0x38   :  { %201 = vmatpush3.xpose.msra.mxu0 %v44_v13 }
  0x39   :  { %202 = vmatprep.subr.mxu0 %v270_v0 }
  0x3c   :  { %203 = vmatpush3.xpose.msra.mxu0 %v43_v14 }
  0x3d   :  { %204 = vmatprep.subr.mxu0 %v270_v0 }
  0x40   :  { %205 = vmatpush3.xpose.msra.mxu0 %v42_v15 }
  0x41   :  { %206 = vmatprep.subr.mxu0 %v270_v0 }
  0x44   :  { %207 = vmatpush3.xpose.msra.mxu0 %v41_v16 }
  0x45   :  { %208 = vmatprep.subr.mxu0 %v270_v0 }
  0x48   :  { %209 = vmatpush3.xpose.msra.mxu0 %v40_v17 }
  0x49   :  { %210 = vmatprep.subr.mxu0 %v270_v0 }
  0x4c   :  { %211 = vmatpush3.xpose.msra.mxu0 %v39_v18 }
  0x4f   :  { %213 = vmatmul.mubr.f32.vlgmr.msra.gmra.mxu0 %v38_v19 }
  0x8c   :  { %v135_v21 = vpop.permute.xlu0 %134 }
 0x10f   :  { %v121_v20 = vpop.f32.mrf.mxu0 }
 0x110   :  { %v137_v24 = vmul.f32 %v135_v21, %v121_v20 }
 0x111   :  { %v214_v22 = vpop.f32.mrf.mxu0 }
 0x112   :  { %v145_v25 = vmul.f32 %v162_v23, %v137_v24 }
 0x114   :  { %146 = vst [vmem:[#allocation5] sm:$0xff] %v145_v25 }
 0x115   :  { %254 = shalt.err (!%p251_p9)
}
 0x116   :  { %156 = dma.vmem_to_hbm [thread:$0]  %s154_s27, 128, %s318_s4, [#allocation4]  }
 0x117   :  { %265 = dma.done.wait [#allocation4], 128  }
 0x118   :  { %266 = vsyncadd [#allocation4], 4294967168 }
 0x119   :  { %160 = vsyncpa [#allocation3], 1 }
 0x11a   :  { %161 = vsyncpa [#allocation4], 1 }

</bundles_post_ra>
